<compile_context>
chip_gen: v7x
topology: tpu7x:2x2x1
jax: 0.10.0
libtpu: 0.0.40
codegen_flags: <defaults>
</compile_context>

<pallas_src>
import math

import jax
import jax.numpy as jnp
from jax.experimental import pallas as pl
from jax.experimental.pallas import tpu as pltpu


def _round_up(x, m):
    return ((x + m - 1) // m) * m


def _classifier_kernel(x_ref, w_ref, b_ref, o_ref):
    # x_ref: (tm, K) bf16 | w_ref: (K, tn) bf16 | b_ref: (1, tn) f32 | o_ref: (tm, tn)
    acc = jnp.dot(x_ref[...], w_ref[...], preferred_element_type=jnp.float32)
    o_ref[...] = (acc + b_ref[...]).astype(o_ref.dtype)


def prepare_classifier_params(weight, bias, compute_dtype=jnp.bfloat16):
    """One-time parameter prep (hoisted out of the hot path).

    weight: (N, K) PyTorch Linear layout -> (K, Npad) compute_dtype, zero-padded cols.
    bias:   (N,)                        -> (1, Npad) float32, zero-padded.
    """
    n, k = weight.shape
    n_pad = _round_up(n, 128)                      # lane-dense class dim
    w_kn = jnp.pad(weight.T.astype(compute_dtype), ((0, 0), (0, n_pad - n)))
    b_1n = jnp.pad(bias.astype(jnp.float32), (0, n_pad - n)).reshape(1, n_pad)
    return w_kn, b_1n


def classifier_forward(x, w_kn, b_1n, num_classes, out_dtype=jnp.float32):
    """x: (B, C, H, W) or (B, K); w_kn: (K, Npad) prepped; b_1n: (1, Npad)."""
    B = x.shape[0]
    x2d = x.reshape(B, -1)                         # torch.flatten(x, 1)
    K = x2d.shape[1]
    Kw, n_pad = w_kn.shape
    assert Kw == K and n_pad >= num_classes
    compute_dtype = w_kn.dtype

    # Tile plan: K whole per block.  Batch padded only to 8-sublane multiples;
    # tm picked as the largest of {256,128,64,32,16,8} that divides b_pad.
    b_pad = _round_up(B, 8)
    tm = 8
    for cand in (256, 128, 64, 32, 16, 8):
        if b_pad % cand == 0:
            tm = cand
            break
    tn = 512 if n_pad % 512 == 0 else (256 if n_pad % 256 == 0 else 128)

    # Cast activations; pad extra batch rows with zeros only if needed.
    x_p = x2d.astype(compute_dtype)
    if b_pad != B:
        x_p = jnp.pad(x_p, ((0, b_pad - B), (0, 0)))

    grid = (b_pad // tm, n_pad // tn)

    flops = 2 * b_pad * K * n_pad
    bytes_accessed = (x_p.size * x_p.dtype.itemsize
                      + w_kn.size * w_kn.dtype.itemsize
                      + b_1n.size * 4
                      + b_pad * n_pad * jnp.dtype(out_dtype).itemsize)

    out_padded = pl.pallas_call(
        _classifier_kernel,
        out_shape=jax.ShapeDtypeStruct((b_pad, n_pad), out_dtype),
        grid=grid,
        in_specs=[
            pl.BlockSpec((tm, K), lambda i, j: (i, 0)),
            pl.BlockSpec((K, tn), lambda i, j: (0, j)),
            pl.BlockSpec((1, tn), lambda i, j: (0, j)),
        ],
        out_specs=pl.BlockSpec((tm, tn), lambda i, j: (i, j)),
        compiler_params=pltpu.CompilerParams(
            dimension_semantics=("parallel", "parallel")),
        cost_estimate=pl.CostEstimate(
            flops=flops, transcendentals=0, bytes_accessed=bytes_accessed),
    )(x_p, w_kn, b_1n)

    return out_padded[:B, :num_classes]


if __name__ == "__main__":
    # Module config: Classifier(expansion=1, num_classes=10)
    expansion = 1
    num_classes = 10
    in_features = 512 * expansion
    batch = 2

    key = jax.random.PRNGKey(0)
    kx, kw, kb = jax.random.split(key, 3)

    # Input in NCHW as produced by a ResNet trunk (spatial pooled to 1x1).
    x = jax.random.normal(kx, (batch, in_features, 1, 1), dtype=jnp.float32)

    # Deterministic synthetic parameters (PyTorch Linear shapes: (out, in), (out,)).
    bound = 1.0 / math.sqrt(in_features)
    weight = jax.random.uniform(kw, (num_classes, in_features),
                                minval=-bound, maxval=bound, dtype=jnp.float32)
    bias = jax.random.uniform(kb, (num_classes,),
                              minval=-bound, maxval=bound, dtype=jnp.float32)

    # One-time parameter prep (transpose + pad + bf16 cast hoisted out of the hot path).
    w_kn, b_1n = prepare_classifier_params(weight, bias)

    fwd = jax.jit(classifier_forward, static_argnames=("num_classes", "out_dtype"))
    out = fwd(x, w_kn, b_1n, num_classes)
    out = jax.block_until_ready(out)

    # Reference check in plain JAX (same semantics as torch.flatten + nn.Linear).
    ref = x.reshape(batch, -1) @ weight.T + bias
    assert out.shape == (batch, num_classes)
    # bf16 operands with f32 accumulation -> ~1e-3..1e-2 absolute error vs f32 ref.
    assert jnp.allclose(out, ref, atol=2e-2, rtol=2e-2), \
        f"max abs err = {jnp.max(jnp.abs(out - ref))}"

    print("KERNEL_OK")
</pallas_src>

<mosaic_0001>
module attributes {stable_mosaic.version = 11 : i64} {
  func.func @_classifier_kernel(%arg0: i32, %arg1: i32, %arg2: memref<8x512xbf16, #tpu.memory_space<vmem>>, %arg3: memref<512x128xbf16, #tpu.memory_space<vmem>>, %arg4: memref<1x128xf32, #tpu.memory_space<vmem>>, %arg5: memref<8x128xf32, #tpu.memory_space<vmem>>) attributes {dimension_semantics = [#tpu.dimension_semantics<parallel>, #tpu.dimension_semantics<parallel>], iteration_bounds = array<i64: 1, 1>, scalar_prefetch = 0 : i64, scratch_operands = 0 : i64, tpu.core_type = #tpu.core_type<tc>, window_params = [{transform_indices = @transform_0, window_bounds = array<i64: 8, 512>}, {transform_indices = @transform_1, window_bounds = array<i64: 512, 128>}, {transform_indices = @transform_2, window_bounds = array<i64: 1, 128>}, {transform_indices = @transform_3, window_bounds = array<i64: 8, 128>}]} {
    %c0 = arith.constant 0 : index
    %c0_0 = arith.constant 0 : index
    %0 = vector.load %arg2[%c0, %c0_0] : memref<8x512xbf16, #tpu.memory_space<vmem>>, vector<8x512xbf16>
    %c0_1 = arith.constant 0 : index
    %c0_2 = arith.constant 0 : index
    %1 = vector.load %arg3[%c0_1, %c0_2] : memref<512x128xbf16, #tpu.memory_space<vmem>>, vector<512x128xbf16>
    %cst = arith.constant dense<0.000000e+00> : vector<8x128xf32>
    %2 = tpu.matmul %0, %1, %cst {dimension_numbers = #tpu.dot_dimension_numbers<[1], [0], [0], [1], [0, 0, 1, 1], [], []>} : vector<8x512xbf16>, vector<512x128xbf16>, vector<8x128xf32> -> vector<8x128xf32>
    %c0_3 = arith.constant 0 : index
    %c0_4 = arith.constant 0 : index
    %3 = vector.load %arg4[%c0_3, %c0_4] : memref<1x128xf32, #tpu.memory_space<vmem>>, vector<1x128xf32>
    %4 = vector.broadcast %3 : vector<1x128xf32> to vector<8x128xf32>
    %5 = arith.addf %2, %4 : vector<8x128xf32>
    %c0_5 = arith.constant 0 : index
    %c0_6 = arith.constant 0 : index
    %6 = vector.load %arg5[%c0_5, %c0_6] : memref<8x128xf32, #tpu.memory_space<vmem>>, vector<8x128xf32>
    tpu.vector_store %arg5[%c0_5, %c0_6], %5 {strides = array<i32>} : memref<8x128xf32, #tpu.memory_space<vmem>>, vector<8x128xf32>,
    return
  }
  func.func @transform_0(%arg0: i32, %arg1: i32) -> (i32, i32) {
    %c0_i32 = arith.constant 0 : i32
    %c0_i32_0 = arith.constant 0 : i32
    return %arg0, %c0_i32 : i32, i32
  }
  func.func @transform_1(%arg0: i32, %arg1: i32) -> (i32, i32) {
    %c0_i32 = arith.constant 0 : i32
    %c0_i32_0 = arith.constant 0 : i32
    return %c0_i32, %arg1 : i32, i32
  }
  func.func @transform_2(%arg0: i32, %arg1: i32) -> (i32, i32) {
    %c0_i32 = arith.constant 0 : i32
    %c0_i32_0 = arith.constant 0 : i32
    return %c0_i32, %arg1 : i32, i32
  }
  func.func @transform_3(%arg0: i32, %arg1: i32) -> (i32, i32) {
    %c0_i32 = arith.constant 0 : i32
    return %arg0, %arg1 : i32, i32
  }
}

</mosaic_0001>

<bundles_post_ra>
// kernel: classifier_forward.1
= control target key start
LH: loop header
LB: loop body
LE: loop exit
PB: predicated region body
PF: predicated region fallthrough
CT: control target
= control target key end

     0   :  { %8 = vsyncpa [#allocation3], 0  ;;  %s538_s12 = smov [#allocation2]   ;;  %s585_s0 = inlined_call_operand.vmem [shape: bf16[8,512], index: 0, kind: input, shape index: {}]   ;;  %s586_s1 = inlined_call_operand.hbm [shape: bf16[512,128], index: 1, kind: input, shape index: {}]   ;;  %s587_s2 = inlined_call_operand.vmem [shape: f32[1,128], index: 2, kind: input, shape index: {}]   ;;  %s588_s3 = inlined_call_operand.vmem [shape: f32[8,128], index: 3, kind: output, shape index: {}]  }
   0x1   :  { %s16_s13 = sshll.u32 %s538_s12, 4  ;;  %s514_s16 = scalar_lea.hbm %s586_s1, 4096  ;;  %s17_s13 = int_to_ptr.vmem [resolvable:$true] %s16_s13 }
   0x2   :  { %p515_p0 = scmp.ne.s32.totalorder %s586_s1, %s514_s16  ;;  %p518_p1 = scmp.lt.u32.totalorder %s514_s16, %s586_s1 }
   0x4   :  { %p520_p2 = pnand %p518_p1, %p515_p0 }
   0x6   :  { %523 = shalt.err (!%p520_p2)
}
   0x7   :  { %s524_s21 = scalar_lea.vmem %s17_s13, 4096  ;;  %p529_p4 = scmp.lt.s32.totalorder %s17_s13, %s17_s13 }
   0x8   :  { %p525_p3 = scmp.ne.s32.totalorder %s17_s13, %s524_s21  ;;  %p530_p5 = scmp.lt.s32.totalorder %s524_s21, %s524_s21 }
   0xa   :  { %p531_p6 = por %p530_p5, %p529_p4 }
   0xc   :  { %p532_p7 = pnand %p531_p6, %p525_p3 }
   0xe   :  { %535 = shalt.err (!%p532_p7)
}
   0xf   :  { %s539_s22 = smov 64   ;;  %s540_s23 = smov 4  }
  0x10   :  { %22 = dma.hbm_to_vmem [thread:$0]  %s586_s1, 4096, %s17_s13, [#allocation3], %s539_s22, %s539_s22, %s540_s23  }
  0x11   :  { %536 = dma.done.wait [#allocation3], 4096  }
  0x12   :  { %537 = vsyncadd [#allocation3], 4294963200  ;;  %v478_v0 = vld [vmem:[#allocation2 + $0x40] sm:$0xff]   ;;  %v482_v4 = vld [vmem:[#allocation2 + $0x48] sm:$0xff]  }
  0x13   :  { %v479_v1 = vld [vmem:[#allocation2 + $0xc0] sm:$0xff]   ;;  %431 = vmatprep.subr.bf16.mxu0 %v478_v0  ;;  %v483_v5 = vld [vmem:[#allocation2 + $0xc8] sm:$0xff]   ;;  %v486_v8 = vld [vmem:[#allocation2 + $0x50] sm:$0xff]  }
  0x14   :  { %v480_v2 = vld [vmem:[#allocation2] sm:$0xff]   ;;  %453 = vmatprep.subr.bf16.mxu1 %v479_v1  ;;  %v484_v6 = vld [vmem:[#allocation2 + $0x8] sm:$0xff]   ;;  %v487_v9 = vld [vmem:[#allocation2 + $0xd0] sm:$0xff]  }
  0x15   :  { %v481_v3 = vld [vmem:[#allocation2 + $0x80] sm:$0xff]   ;;  %432 = vmatpush3.bf16.msra.mxu0 %v480_v2  ;;  %v485_v7 = vld [vmem:[#allocation2 + $0x88] sm:$0xff]   ;;  %v488_v10 = vld [vmem:[#allocation2 + $0x10] sm:$0xff]  }
  0x16   :  { %454 = vmatpush3.bf16.msra.mxu1 %v481_v3  ;;  %433 = vmatprep.subr.bf16.mxu0 %v482_v4  ;;  %v489_v11 = vld [vmem:[#allocation2 + $0x90] sm:$0xff]   ;;  %v490_v12 = vld [vmem:[#allocation2 + $0x58] sm:$0xff]   ;;  %v494_v16 = vld [vmem:[#allocation2 + $0x60] sm:$0xff]  }
  0x17   :  { %455 = vmatprep.subr.bf16.mxu1 %v483_v5  ;;  %v491_v13 = vld [vmem:[#allocation2 + $0xd8] sm:$0xff]   ;;  %v495_v17 = vld [vmem:[#allocation2 + $0xe0] sm:$0xff]   ;;  %v498_v20 = vld [vmem:[#allocation2 + $0x68] sm:$0xff]  }
  0x18   :  { %v492_v14 = vld [vmem:[#allocation2 + $0x18] sm:$0xff]   ;;  %v496_v18 = vld [vmem:[#allocation2 + $0x20] sm:$0xff]   ;;  %v499_v21 = vld [vmem:[#allocation2 + $0xe8] sm:$0xff]  }
  0x19   :  { %434 = vmatpush3.bf16.msra.mxu0 %v484_v6  ;;  %v493_v15 = vld [vmem:[#allocation2 + $0x98] sm:$0xff]   ;;  %v497_v19 = vld [vmem:[#allocation2 + $0xa0] sm:$0xff]   ;;  %v500_v22 = vld [vmem:[#allocation2 + $0x28] sm:$0xff]  }
  0x1a   :  { %456 = vmatpush3.bf16.msra.mxu1 %v485_v7  ;;  %435 = vmatprep.subr.bf16.mxu0 %v486_v8  ;;  %v501_v23 = vld [vmem:[#allocation2 + $0xa8] sm:$0xff]   ;;  %v502_v24 = vld [vmem:[#allocation2 + $0x70] sm:$0xff]   ;;  %v506_v28 = vld [vmem:[#allocation2 + $0x78] sm:$0xff]  }
  0x1b   :  { %457 = vmatprep.subr.bf16.mxu1 %v487_v9  ;;  %v503_v25 = vld [vmem:[#allocation2 + $0xf0] sm:$0xff]   ;;  %v507_v29 = vld [vmem:[#allocation2 + $0xf8] sm:$0xff]   ;;  %v29_v32 = vld [vmem:[%s585_s0] sm:$0xff] }
  0x1c   :  { %v504_v26 = vld [vmem:[#allocation2 + $0x30] sm:$0xff]   ;;  %v508_v30 = vld [vmem:[#allocation2 + $0x38] sm:$0xff]   ;;  %v30_v33 = vld [vmem:[%s585_s0 + $0x8] sm:$0xff]  ;;  %v395_v34 = vcombine.low %v29_v32, %v29_v32  ;;  %v396_v35 = vcombine.high %v29_v32, %v29_v32 }
  0x1d   :  { %436 = vmatpush3.bf16.msra.mxu0 %v488_v10  ;;  %v505_v27 = vld [vmem:[#allocation2 + $0xb0] sm:$0xff]   ;;  %v509_v31 = vld [vmem:[#allocation2 + $0xb8] sm:$0xff]   ;;  %v397_v36 = vcombine.low %v30_v33, %v30_v33  ;;  %v398_v37 = vcombine.high %v30_v33, %v30_v33  ;;  %v394_v40 = vld [vmem:[%s587_s2] ss:$0 sm:$0xff] }
  0x1e   :  { %458 = vmatpush3.bf16.msra.mxu1 %v489_v11  ;;  %437 = vmatprep.subr.bf16.mxu0 %v490_v12 }
  0x1f   :  { %459 = vmatprep.subr.bf16.mxu1 %v491_v13  ;;  %340 = vmatprep.mubr.bf16.mxu0 %v396_v35 }
  0x20   :  { %380 = vmatprep.mubr.bf16.mxu1 %v398_v37 }
  0x21   :  { %438 = vmatpush3.bf16.msra.mxu0 %v492_v14 }
  0x22   :  { %460 = vmatpush3.bf16.msra.mxu1 %v493_v15  ;;  %439 = vmatprep.subr.bf16.mxu0 %v494_v16 }
  0x23   :  { %461 = vmatprep.subr.bf16.mxu1 %v495_v17 }
  0x25   :  { %440 = vmatpush3.bf16.msra.mxu0 %v496_v18 }
  0x26   :  { %462 = vmatpush3.bf16.msra.mxu1 %v497_v19  ;;  %441 = vmatprep.subr.bf16.mxu0 %v498_v20 }
  0x27   :  { %463 = vmatprep.subr.bf16.mxu1 %v499_v21 }
  0x29   :  { %442 = vmatpush3.bf16.msra.mxu0 %v500_v22 }
  0x2a   :  { %464 = vmatpush3.bf16.msra.mxu1 %v501_v23  ;;  %443 = vmatprep.subr.bf16.mxu0 %v502_v24 }
  0x2b   :  { %465 = vmatprep.subr.bf16.mxu1 %v503_v25 }
  0x2d   :  { %444 = vmatpush3.bf16.msra.mxu0 %v504_v26 }
  0x2e   :  { %466 = vmatpush3.bf16.msra.mxu1 %v505_v27  ;;  %445 = vmatprep.subr.bf16.mxu0 %v506_v28 }
  0x2f   :  { %467 = vmatprep.subr.bf16.mxu1 %v507_v29 }
  0x31   :  { %446 = vmatpush3.bf16.msra.mxu0 %v508_v30 }
  0x32   :  { %468 = vmatpush3.bf16.msra.mxu1 %v509_v31 }
  0x34   :  { %341 = vmatmul.mubr.bf16.vlgmr.msra.gmra.mrb[0].mxu0 %v395_v34 }
  0x35   :  { %381 = vmatmul.mubr.bf16.vlgmr.msra.gmra.mrb[0].mxu1 %v397_v36 }
 0x107   :  { %v447_v38 = vpop.f32.mrb[0].mxu0 }
 0x108   :  { %v469_v39 = vpop.f32.mrb[0].mxu1  ;;  %v448_v41 = vpop.f32.mrb[1].mxu0 }
 0x109   :  { %v470_v42 = vpop.f32.mrb[1].mxu1  ;;  %v449_v43 = vadd.f32 %v448_v41, %v447_v38  ;;  %v450_v45 = vpop.f32.mrb[2].mxu0 }
 0x10a   :  { %v471_v44 = vadd.f32 %v470_v42, %v469_v39  ;;  %v472_v46 = vpop.f32.mrb[2].mxu1  ;;  %v451_v47 = vpop.f32.mrb[3].mxu0 }
 0x10b   :  { %v473_v48 = vpop.f32.mrb[3].mxu1  ;;  %v343_v49 = vadd.f32 %v449_v43, %v394_v40 }
 0x10d   :  { %v383_v50 = vadd.f32 %v471_v44, %v343_v49 }
 0x10f   :  { %388 = vst [vmem:[%s588_s3] sm:$0xff] %v383_v50 }
 0x110   :  { %393 = vsyncpa [#allocation3], 1 }

</bundles_post_ra>
